<compile_context>
chip_gen: v5e
topology: v5e:2x2
jax: 0.10.0
libtpu: 0.0.40
codegen_flags: <defaults>
</compile_context>

<pallas_src>
import math

import jax
import jax.numpy as jnp
from jax.experimental import pallas as pl
from jax.experimental.pallas import tpu as pltpu


def _round_up(x, m):
    return ((x + m - 1) // m) * m


def _choose_tm(M, tm_max):
    """Pick the M (row) tile size.

    Preference order: sublane-aligned tiles; >= 2 tiles so the "parallel" M axis
    can shard across v7x's two TensorCores; tile sizes that cover M exactly so
    no wrapper pad / output slice is needed.
    """
    tm_max = max(8, (tm_max // 8) * 8)
    if M <= 8:
        return max(M, 1)                       # one full-extent block
    if M <= 2 * tm_max:
        half = _round_up((M + 1) // 2, 8)      # split into two aligned tiles
        return min(half, _round_up(M, 8))
    for cand in (tm_max, tm_max // 2, tm_max // 4, tm_max // 8):
        if cand >= 8 and M % cand == 0:        # exact cover -> no pad / slice
            return cand
    return tm_max                              # rare ragged edge: pad + slice


def _linear_kernel(x_ref, w_ref, b_ref, o_ref):
    # One MXU matmul over the full (small) K, f32 accumulation, fused bias,
    # lane-dense store of the full-N output tile.
    o_ref[...] = (
        jnp.dot(x_ref[...], w_ref[...], preferred_element_type=jnp.float32)
        + b_ref[...]
    ).astype(o_ref.dtype)


def feature_transform(x, weight, bias, *, tm=1024):
    """y = x @ weight.T + bias   (torch.nn.Linear(feature_size, d_model) forward).

    x      : (..., feature_size)
    weight : (d_model, feature_size)   -- PyTorch layout
    bias   : (d_model,)
    """
    orig_shape = x.shape
    K = orig_shape[-1]
    N, Kw = weight.shape
    assert Kw == K, (weight.shape, K)
    M = int(math.prod(orig_shape[:-1])) if len(orig_shape) > 1 else 1

    x2 = x.reshape(M, K)
    w = weight.T                     # (K, N): kernel computes x @ W directly
    b = bias.reshape(1, N)

    tm = _choose_tm(M, tm)
    grid_m = pl.cdiv(M, tm)
    Mp = grid_m * tm
    padded = Mp != M
    if padded:
        # Rare ragged-M path. Only whole zero rows are appended; K (the
        # contracted dim) is never padded or ragged, so the dot is exact.
        x2 = jnp.zeros((Mp, K), x2.dtype).at[:M, :].set(x2)

    # Working set: double-buffered x and out tiles + VMEM-resident W and bias.
    itemsize = jnp.dtype(x.dtype).itemsize
    working = (2 * tm * K + 2 * tm * N + K * N + N) * itemsize
    vmem_limit = int(min(48 * 1024 * 1024, max(2 * working, 4 * 1024 * 1024)))

    out = pl.pallas_call(
        _linear_kernel,
        out_shape=jax.ShapeDtypeStruct((Mp, N), x.dtype),
        grid_spec=pltpu.PrefetchScalarGridSpec(
            num_scalar_prefetch=0,
            grid=(grid_m,),
            in_specs=[
                pl.BlockSpec((tm, K), lambda i: (i, 0)),  # streamed x tile
                pl.BlockSpec((K, N), lambda i: (0, 0)),   # VMEM-resident W
                pl.BlockSpec((1, N), lambda i: (0, 0)),   # VMEM-resident bias
            ],
            out_specs=pl.BlockSpec((tm, N), lambda i: (i, 0)),
        ),
        compiler_params=pltpu.CompilerParams(
            dimension_semantics=("parallel",),
            vmem_limit_bytes=vmem_limit,
        ),
    )(x2, w, b)

    if padded:
        out = out[:M]
    return out.reshape(*orig_shape[:-1], N)


if __name__ == "__main__":
    key = jax.random.PRNGKey(0)
    kx, kw, kb = jax.random.split(key, 3)

    # Shapes consistent with the module's forward: x is (seq, batch, feature_size).
    seq, batch, feature_size, d_model = 8, 2, 16, 32

    x = jax.random.normal(kx, (seq, batch, feature_size), jnp.float32)

    # torch.nn.Linear default init: U(-1/sqrt(fan_in), 1/sqrt(fan_in)) for W and b.
    bound = 1.0 / math.sqrt(feature_size)
    weight = jax.random.uniform(kw, (d_model, feature_size), jnp.float32, -bound, bound)
    bias = jax.random.uniform(kb, (d_model,), jnp.float32, -bound, bound)

    y = feature_transform(x, weight, bias)
    jax.block_until_ready(y)

    # Pure-JAX reference check before declaring success.
    y_ref = x @ weight.T + bias
    assert y.shape == (seq, batch, d_model)
    assert bool(jnp.isfinite(y).all())
    assert jnp.allclose(y, y_ref, atol=1e-5, rtol=1e-5)

    print("KERNEL_OK")
</pallas_src>

<mosaic_0001>
module attributes {stable_mosaic.version = 11 : i64} {
  func.func @_linear_kernel(%arg0: i32, %arg1: memref<8x16xf32, #tpu.memory_space<vmem>>, %arg2: memref<16x32xf32, #tpu.memory_space<vmem>>, %arg3: memref<1x32xf32, #tpu.memory_space<vmem>>, %arg4: memref<8x32xf32, #tpu.memory_space<vmem>>) attributes {dimension_semantics = [#tpu.dimension_semantics<parallel>], iteration_bounds = array<i64: 2>, scalar_prefetch = 0 : i64, scratch_operands = 0 : i64, tpu.core_type = #tpu.core_type<tc>, window_params = [{transform_indices = @transform_0, window_bounds = array<i64: 8, 16>}, {pipeline_mode = #tpu.pipeline_mode<synchronous>, transform_indices = @transform_1, window_bounds = array<i64: 16, 32>}, {pipeline_mode = #tpu.pipeline_mode<synchronous>, transform_indices = @transform_2, window_bounds = array<i64: 1, 32>}, {transform_indices = @transform_3, window_bounds = array<i64: 8, 32>}]} {
    %c0 = arith.constant 0 : index
    %c0_0 = arith.constant 0 : index
    %0 = vector.load %arg1[%c0, %c0_0] : memref<8x16xf32, #tpu.memory_space<vmem>>, vector<8x16xf32>
    %c0_1 = arith.constant 0 : index
    %c0_2 = arith.constant 0 : index
    %1 = vector.load %arg2[%c0_1, %c0_2] : memref<16x32xf32, #tpu.memory_space<vmem>>, vector<16x32xf32>
    %cst = arith.constant dense<0.000000e+00> : vector<8x32xf32>
    %2 = tpu.matmul %0, %1, %cst {dimension_numbers = #tpu.dot_dimension_numbers<[1], [0], [0], [1], [0, 0, 1, 1], [], []>} : vector<8x16xf32>, vector<16x32xf32>, vector<8x32xf32> -> vector<8x32xf32>
    %c0_3 = arith.constant 0 : index
    %c0_4 = arith.constant 0 : index
    %3 = vector.load %arg3[%c0_3, %c0_4] : memref<1x32xf32, #tpu.memory_space<vmem>>, vector<1x32xf32>
    %4 = vector.broadcast %3 : vector<1x32xf32> to vector<8x32xf32>
    %5 = arith.addf %2, %4 : vector<8x32xf32>
    %c0_5 = arith.constant 0 : index
    %c0_6 = arith.constant 0 : index
    %6 = vector.load %arg4[%c0_5, %c0_6] : memref<8x32xf32, #tpu.memory_space<vmem>>, vector<8x32xf32>
    tpu.vector_store %arg4[%c0_5, %c0_6], %5 {strides = array<i32>} : memref<8x32xf32, #tpu.memory_space<vmem>>, vector<8x32xf32>,
    return
  }
  func.func @transform_0(%arg0: i32) -> (i32, i32) {
    %c0_i32 = arith.constant 0 : i32
    %c0_i32_0 = arith.constant 0 : i32
    return %arg0, %c0_i32 : i32, i32
  }
  func.func @transform_1(%arg0: i32) -> (i32, i32) {
    %c0_i32 = arith.constant 0 : i32
    %c0_i32_0 = arith.constant 0 : i32
    %c0_i32_1 = arith.constant 0 : i32
    return %c0_i32, %c0_i32_0 : i32, i32
  }
  func.func @transform_2(%arg0: i32) -> (i32, i32) {
    %c0_i32 = arith.constant 0 : i32
    %c0_i32_0 = arith.constant 0 : i32
    %c0_i32_1 = arith.constant 0 : i32
    return %c0_i32, %c0_i32_0 : i32, i32
  }
  func.func @transform_3(%arg0: i32) -> (i32, i32) {
    %c0_i32 = arith.constant 0 : i32
    %c0_i32_0 = arith.constant 0 : i32
    return %arg0, %c0_i32 : i32, i32
  }
}

</mosaic_0001>

<bundles_post_ra>
// kernel: tpu_custom_call.1
= control target key start
LH: loop header
LB: loop body
LE: loop exit
PB: predicated region body
PF: predicated region fallthrough
CT: control target
= control target key end

     0   :  { %8 = vsyncpa [#allocation3], 0  ;;  %s703_s0 = inlined_call_operand.hbm [shape: f32[16,16], index: 0, kind: input, shape index: {}]   ;;  %s704_s1 = inlined_call_operand.hbm [shape: f32[16,32], index: 1, kind: input, shape index: {}]   ;;  %s705_s2 = inlined_call_operand.vmem [shape: f32[1,32], index: 2, kind: input, shape index: {}]   ;;  %s706_s3 = inlined_call_operand.hbm [shape: f32[16,32], index: 3, kind: output, shape index: {}]  }
   0x1   :  { %10 = vsyncpa [#allocation3 + $0x1], 0 }
   0x2   :  { %11 = vsyncpa [#allocation6], 0 }
   0x3   :  { %12 = vsyncpa [#allocation4], 0 }
   0x4   :  { %14 = vsyncpa [#allocation4 + $0x1], 0  ;;  %s564_s12 = smov 0   ;;  %s566_s13 = smov 0  }
   0x5   :  { %s568_s14 = smov 0   ;;  %s570_s15 = smov 0  }
   0x6 LB: > { %s130_s18 = sshll.u32 %s704_s1, 4  ;;  %s588_s19 = sadd.s32 4294967295, %s539_s15   ;;  %s539_s15 = sphi %s570_s15, %s716_s15   ;;  %s535_s14 = sphi %s568_s14, %s715_s14   ;;  %s531_s13 = sphi %s566_s13, %s714_s13   ;;  %s527_s12 = sphi %s564_s12, %s713_s12   ;;  %s131_s18 = int_to_ptr.hbm [resolvable:$true] %s130_s18 }
   0x7   : > { %p335_p0 = scmp.ge.s32.totalorder %s539_s15, 1  ;;  %p41_p1 = scmp.eq.s32.totalorder %s588_s19, 0 }
   0x8   : > { %p119_p2 = scmp.lt.s32.totalorder %s539_s15, 3  ;;  %s541_s21 = smov [#allocation5]  }
   0x9   : > { %s132_s22 = sshll.u32 %s541_s21, 4  ;;  %s542_s23 = smov 128   ;;  %s133_s22 = int_to_ptr.vmem [resolvable:$true] %s132_s22 }
   0xa   : > { %p593_p3 = pnand %p335_p0, %p119_p2  ;;  %s543_s24 = smov 8  }
   0xb   : > { %s334_s25 = sadd.s32 4294967294, %s539_s15   ;;  %s604_s26 = sadd.s32 1, %s539_s15  }
   0xc   : > { %p357_p4 = pneg %p593_p3  ;;  %s27_s27 = sadd.s32 1, %s535_s14 }
   0xd   : > { %s24_s28 = ssub.s32 %s539_s15, %s604_s26  ;;  %p34_p7 = scmp.ne.s32.totalorder %s535_s14, %s531_s13 }
   0xe   : > { %p358_p6 = pnand %p357_p4, %p41_p1  ;;  %p25_p8 = scmp.eq.s32.totalorder %s24_s28, 0 }
   0xf   : > { %p35_p9 = scmp.eq.s32.totalorder %s539_s15, 0  ;;  %p40_p10 = scmp.ne.s32.totalorder %s531_s13, %s527_s12 }
  0x10   : > { %360 = dma.hbm_to_vmem [thread:$0]  (!%p358_p6), %s131_s18, 256, %s133_s22, [#allocation6], %s542_s23, %s542_s23, %s543_s24  }
  0x11   : > { %p106_p11 = scmp.eq.s32.totalorder %s588_s19, 1  ;;  %p620_p12 = por %p41_p1, %p40_p10 }
  0x12   : > { %s616_s29 = scalar_select %p25_p8, %s535_s14, %s27_s27  }
  0x13   : > { %p624_p13 = por %p106_p11, %p34_p7  ;;  %p112_p0 = scmp.eq.s32.totalorder %s334_s25, 1 }
  0x14   : > { %p36_p2 = por %p35_p9, %p34_p7  ;;  %s149_s5 = sand.u32 1, %s535_s14  }
  0x15   : > { %p629_p4 = por %p112_p0, %p40_p10  ;;  %p370_p6 = scmp.lt.s32.totalorder %s539_s15, 2 }
  0x16   : > { %s338_s7 = sshll.u32 %s149_s5, 3  ;;  %s339_s8 = sshll.u32 %s539_s15, 3 }
  0x17   : > { %s157_s11 = scalar_lea.hbm %s703_s0, %s339_s8  ;;  %s153_s17 = scalar_lea.vmem [#allocation2], %s338_s7 }
  0x18   : > { %s159_s16 = sshll.u32 %s157_s11, 4  ;;  %s161_s18 = sshll.u32 %s153_s17, 4  ;;  %s160_s16 = int_to_ptr.hbm [resolvable:$true] %s159_s16  ;;  %s162_s18 = int_to_ptr.vmem [resolvable:$true] %s161_s18 }
  0x19   : > { %p638_p8 = pnand %p370_p6, %p36_p2  ;;  %s150_s22 = scalar_lea.sflag [#allocation3], %s149_s5 }
  0x1a   : > { %s439_s23 = sshra.s32 %s160_s16, 4  ;;  %s446_s28 = scalar_lea.hbm %s703_s0, 16  ;;  %s440_s23 = int_to_ptr.hbm [resolvable:$true] %s439_s23 }
  0x1b   : > { %s441_s24 = scalar_lea.hbm %s440_s23, 8  ;;  %p443_p9 = pneg %p638_p8 }
  0x1c   : > { %p442_p7 = scmp.ne.s32.totalorder %s440_s23, %s441_s24  ;;  %p447_p0 = scmp.lt.s32.totalorder %s440_s23, %s703_s0 }
  0x1d   : > { %p448_p2 = scmp.lt.s32.totalorder %s446_s28, %s441_s24 }
  0x1e   : > { %p444_p10 = pnand %p443_p9, %p442_p7 }
  0x1f   : > { %p449_p6 = por %p448_p2, %p447_p0 }
  0x20   : > { %p445_p11 = pneg %p444_p10 }
  0x22   : > { %p450_p5 = pnand %p449_p6, %p445_p11 }
  0x24   : > { %453 = shalt.err (!%p450_p5)
}
  0x25   : > { %364 = dma.hbm_to_vmem [thread:$0]  (!%p638_p8), %s160_s16, 128, %s162_s18, %s150_s22  }
  0x26   : > { %170 = sbr.rel (%p593_p3) target bundleno = 181 (0xb5), region = 32  ;;  %s655_s5 = sand.u32 (!%p593_p3), 1, %s531_s13  }
  0x27   : > { %s341_s9 = sshll.u32 (!%p593_p3), %s655_s5, 3  ;;  %s173_s10 = scalar_lea.sflag (!%p593_p3), [#allocation3], %s655_s5 }
  0x28   : > { %s176_s11 = scalar_lea.vmem (!%p593_p3), [#allocation2], %s341_s9 }
  0x2b   : > { %514 = dma.done.wait (%p620_p12), %s173_s10, 128  }
  0x2c   : > { %516 = vsyncadd (%p620_p12), %s173_s10, 4294967168 }
  0x2d   : > { %518 = dma.done.wait (%p41_p1), [#allocation6], 256  }
  0x2e   : > { %520 = vsyncadd (%p41_p1), [#allocation6], 4294967040  ;;  %v207_v0 = vld [vmem:[#allocation5 + $0x8] sm:$0xff]  ;;  %v206_v1 = vld [vmem:[#allocation5] sm:$0xff]  ;;  %vm212_vm0 = vcmask 130048   ;;  %s346_s20 = sshll.u32 %s588_s19, 3 }
  0x2f   : > { %230 = vmatpush.msra.mxu0 %v207_v0  ;;  %v205_v2 = vld [vmem:[%s176_s11] sm:$0xff]  ;;  %s249_s30 = scalar_lea.hbm %s706_s3, %s346_s20  ;;  %s204_s22 = scalar_lea.vmem [#allocation7], %s341_s9  ;;  %vm236_vm1 = vcmask 261120  }
  0x30   : > { %v408_v3 = vld [vmem:[%s705_s2] ss:$0 sm:$0xff]  ;;  %s251_s23 = sshll.u32 %s204_s22, 4  ;;  %s253_s24 = sshll.u32 %s249_s30, 4  ;;  %s252_s23 = int_to_ptr.vmem [resolvable:$true] %s251_s23  ;;  %s254_s24 = int_to_ptr.hbm [resolvable:$true] %s253_s24 }
  0x31   : > { %231 = vmatpush.msra.mxu0 %v206_v1  ;;  %s239_s25 = scalar_lea.sflag [#allocation4], %s655_s5  ;;  %s483_s19 = sshra.s32 %s254_s24, 4  ;;  %s484_s19 = int_to_ptr.hbm [resolvable:$true] %s483_s19 }
  0x32   : > { %344 = vmatmul.msk.f32.vlgmr.msra.gmra.mxu0 %vm212_vm0, %v205_v2  ;;  %s485_s27 = scalar_lea.hbm %s484_s19, 8  ;;  %s489_s8 = scalar_lea.hbm %s706_s3, 16 }
  0x33   : > { %p486_p1 = scmp.ne.s32.totalorder %s484_s19, %s485_s27  ;;  %p490_p12 = scmp.lt.s32.totalorder %s484_s19, %s706_s3 }
  0x34   : > { %p491_p8 = scmp.lt.s32.totalorder %s489_s8, %s485_s27 }
  0x35   : > { %p487_p3 = pnand %p486_p1, %p624_p13 }
  0x36   : > { %p492_p7 = por %p491_p8, %p490_p12 }
  0x37   : > { %p488_p5 = pneg %p487_p3 }
  0x39   : > { %p493_p9 = pnand %p492_p7, %p488_p5 }
  0xaf   : > { %v233_v4 = vpop.f32.mrf.mxu0 }
  0xb0   : > { %v234_v5 = vadd.f32 %v408_v3, %v233_v4 }
  0xb2   : > { %237 = vst.msk [vmem:[%s204_s22] sm:$0xff] %vm236_vm1, %v234_v5 }
  0xb3   : > { %496 = shalt.err (!%p493_p9)
}
  0xb4   : > { %355 = dma.vmem_to_hbm [thread:$0]  (%p624_p13), %s252_s23, 128, %s254_s24, %s239_s25  }
  0xb5 PF: > { %s265_s5 = sand.u32 1, %s527_s12   ;;  %p712_p10 = scmp.ge.s32.totalorder %s539_s15, 2 }
  0xb6   : > { %s266_s11 = scalar_lea.sflag [#allocation4], %s265_s5 }
  0xb7   : > { %p366_p11 = pnand %p712_p10, %p629_p4 }
  0xb9   : > { %p367_p0 = pneg %p366_p11 }
  0xbb   : > { %522 = dma.done.wait (%p367_p0), %s266_s11, 128  }
  0xbc   : > { %524 = vsyncadd (%p367_p0), %s266_s11, 4294967168  ;;  %p17_p2 = scmp.ge.s32.totalorder %s604_s26, 4   ;;  %s713_s12 = smov %s531_s13 }
  0xbd   : > { %s714_s13 = smov %s535_s14  ;;  %s715_s14 = smov %s616_s29 }
  0xbe   : > { %s716_s15 = smov %s604_s26  ;;  %19 = sbr.rel (!%p17_p2) target bundleno = 6 (0x6), region = 81 }
  0xc3   :  { %272 = vsyncpa [#allocation3], 1 }
  0xc4   :  { %274 = vsyncpa [#allocation3 + $0x1], 1 }
  0xc5   :  { %275 = vsyncpa [#allocation6], 1 }
  0xc6   :  { %276 = vsyncpa [#allocation4], 1 }
  0xc7   :  { %278 = vsyncpa [#allocation4 + $0x1], 1 }

</bundles_post_ra>
